<compile_context>
chip_gen: v6e
topology: v6e:2x2x1
jax: 0.10.0
libtpu: 0.0.40
codegen_flags: <defaults>
</compile_context>

<pallas_src>
import functools

import jax
import jax.numpy as jnp
from jax import lax
from jax.experimental import pallas as pl
from jax.experimental.pallas import tpu as pltpu

IGNORE_INDEX = 255
EPS6 = 1e-6   # eps used by soft_dice_loss
EPS5 = 1e-5   # eps used by soft_dice_loss_mc
MIN_CLASS_PIXELS = 10

LANE = 128                      # vreg lane width
ACC_S = 8                       # sublanes per chunk / accumulator plane (one f32 vreg)
CHUNK_PIXELS = ACC_S * LANE     # 1024 pixels per inner-loop chunk


def _focal_weight(base, gamma):
    """(clamped) base**gamma; integer gamma is unrolled into plain VPU multiplies."""
    g = float(gamma)
    if g.is_integer() and 0 <= g <= 8:
        gi = int(g)
        if gi == 0:
            return jnp.ones_like(base)
        w = base
        for _ in range(gi - 1):
            w = w * base
        return w
    # TODO(synk): non-integer gamma still lowers to pow (log+exp on the EUP).
    return base ** g


def _focal_dice_kernel(x_ref, t_ref, i_ref, p_ref, c_ref, f_ref, v_ref, *,
                       gamma, ignore_index):
    """Accumulate sublane/lane-dense partial sums for FocalLossWithDice over one pixel tile.

    x_ref : (C, TS, 128) f32 logits tile (one batch element; pixel axis folded to 2-D)
    t_ref : (1, TS, 128) i32 targets (ignore_index = ignore, also used for padding)
    i_ref : (C, 8, 128)  f32 acc: sum over valid pixels of softmax_c * [target == c]
    p_ref : (C, 8, 128)  f32 acc: sum over valid pixels of softmax_c
    c_ref : (C, 8, 128)  f32 acc: sum over valid pixels of [target == c]
    f_ref : (1, 8, 128)  f32 acc: sum over valid pixels of (1 - p_t)^gamma * log p_t
    v_ref : (1, 8, 128)  f32 acc: count of valid pixels
    All accumulators are elementwise partial sums; the final (tiny) cross-lane reduction
    happens in the JAX epilogue.
    """
    k = pl.program_id(2)                      # pixel-tile (accumulation) axis

    @pl.when(k == 0)
    def _init():
        i_ref[...] = jnp.zeros_like(i_ref)
        p_ref[...] = jnp.zeros_like(p_ref)
        c_ref[...] = jnp.zeros_like(c_ref)
        f_ref[...] = jnp.zeros_like(f_ref)
        v_ref[...] = jnp.zeros_like(v_ref)

    C, TS, _ = x_ref.shape
    n_chunks = TS // ACC_S
    unroll = max(1, min(4, n_chunks))

    # register-resident accumulators carried through the chunk loop
    carry0 = (tuple(i_ref[c] for c in range(C)),
              tuple(p_ref[c] for c in range(C)),
              tuple(c_ref[c] for c in range(C)),
              f_ref[0], v_ref[0])

    def body(ci, carry):
        i_acc, p_acc, c_acc, f_acc, v_acc = carry
        lo = pl.multiple_of(ci * ACC_S, ACC_S)

        xs = [x_ref[c, pl.ds(lo, ACC_S), :] for c in range(C)]   # C x (8,128)
        ts = t_ref[0, pl.ds(lo, ACC_S), :]                       # (8,128) i32

        # per-pixel softmax via unrolled VPU max/add chains (no cross-sublane reduce)
        m = xs[0]
        for c in range(1, C):
            m = jnp.maximum(m, xs[c])
        es = [jnp.exp(xs[c] - m) for c in range(C)]
        s = es[0]
        for c in range(1, C):
            s = s + es[c]
        inv = pl.reciprocal(s, approx=True)
        ps = [es[c] * inv for c in range(C)]
        log_s = jnp.log(s)

        valid = ts != ignore_index
        vf = valid.astype(jnp.float32)
        # ignore_index lies outside [0, C) (asserted in the wrapper), so the one-hot
        # planes are already zero on ignored / padded pixels -> no vf multiply needed.
        ohs = [(ts == c).astype(jnp.float32) for c in range(C)]

        # focal CE term: (1 - p_t)^gamma * log p_t over valid pixels
        xm_t = ohs[0] * (xs[0] - m)
        p_t = ohs[0] * ps[0]
        for c in range(1, C):
            xm_t = xm_t + ohs[c] * (xs[c] - m)
            p_t = p_t + ohs[c] * ps[c]
        logp_t = xm_t - log_s
        w = _focal_weight(jnp.maximum(1.0 - p_t, 0.0), gamma)
        foc = w * logp_t * vf

        i_new = tuple(i_acc[c] + ps[c] * ohs[c] for c in range(C))
        p_new = tuple(p_acc[c] + ps[c] * vf for c in range(C))
        c_new = tuple(c_acc[c] + ohs[c] for c in range(C))
        return (i_new, p_new, c_new, f_acc + foc, v_acc + vf)

    i_fin, p_fin, c_fin, f_fin, v_fin = lax.fori_loop(
        0, n_chunks, body, carry0, unroll=unroll)

    for c in range(C):
        i_ref[c] = i_fin[c]
        p_ref[c] = p_fin[c]
        c_ref[c] = c_fin[c]
    f_ref[0] = f_fin
    v_ref[0] = v_fin


def _round_up(a, m):
    return ((a + m - 1) // m) * m


def focal_loss_with_dice(logits_nchw, targets, *, num_classes, gamma=2.0,
                         ce_weight=1.0, d_weight=0.1, ignore_index=IGNORE_INDEX,
                         tile_pixels=65536):
    """Forward of FocalLossWithDice (ohpm=False path, weight=None, size_average=True)."""
    B, C, H, W = logits_nchw.shape
    assert C == num_classes
    # The kernel skips the onehot*valid product; only valid while ignore_index can never
    # collide with a real class id.
    assert not (0 <= ignore_index < num_classes)
    HW = H * W

    # Free reshapes only -- no NCHW transpose.  Fold the pixel axis to (sublanes, 128 lanes)
    # so every per-pixel vector op fills a whole (8,128) vreg.
    x = logits_nchw.reshape(B, C, HW).astype(jnp.float32)
    t = targets.reshape(B, 1, HW).astype(jnp.int32)

    # Pixel tile: large (amortizes ~0.35us per-grid-step overhead), multiple of the
    # 1024-pixel chunk, but no larger than the (rounded-up) per-image pixel count.
    tp = min(_round_up(int(tile_pixels), CHUNK_PIXELS), _round_up(HW, CHUNK_PIXELS))
    hw_pad = _round_up(HW, tp)
    if hw_pad != HW:
        x = jnp.pad(x, ((0, 0), (0, 0), (0, hw_pad - HW)))
        t = jnp.pad(t, ((0, 0), (0, 0), (0, hw_pad - HW)),
                    constant_values=ignore_index)
    s_total = hw_pad // LANE
    ts_tile = tp // LANE                       # sublanes per tile (multiple of 8)
    x = x.reshape(B, C, s_total, LANE)
    t = t.reshape(B, 1, s_total, LANE)

    n_tiles = hw_pad // tp
    # Keep both v7x TensorCores busy even when the batch axis alone cannot: for B==1 split
    # the pixel tiles across a second parallel axis with per-split accumulator copies.
    n_par = 2 if (B == 1 and n_tiles >= 2 and n_tiles % 2 == 0) else 1
    n_k = n_tiles // n_par
    grid = (B, n_par, n_k)

    kernel = functools.partial(_focal_dice_kernel, gamma=float(gamma),
                               ignore_index=int(ignore_index))

    cls_shape = jax.ShapeDtypeStruct((B, n_par, C, ACC_S, LANE), jnp.float32)
    row_shape = jax.ShapeDtypeStruct((B, n_par, 1, ACC_S, LANE), jnp.float32)
    cls_spec = pl.BlockSpec((pl.Squeezed(), pl.Squeezed(), C, ACC_S, LANE),
                            lambda b, p, k: (b, p, 0, 0, 0))
    row_spec = pl.BlockSpec((pl.Squeezed(), pl.Squeezed(), 1, ACC_S, LANE),
                            lambda b, p, k: (b, p, 0, 0, 0))

    i_out, p_out, c_out, f_out, v_out = pl.pallas_call(
        kernel,
        out_shape=(cls_shape, cls_shape, cls_shape, row_shape, row_shape),
        grid_spec=pltpu.PrefetchScalarGridSpec(
            num_scalar_prefetch=0,
            grid=grid,
            in_specs=[
                pl.BlockSpec((pl.Squeezed(), C, ts_tile, LANE),
                             lambda b, p, k: (b, 0, p * n_k + k, 0)),
                pl.BlockSpec((pl.Squeezed(), 1, ts_tile, LANE),
                             lambda b, p, k: (b, 0, p * n_k + k, 0)),
            ],
            out_specs=[cls_spec, cls_spec, cls_spec, row_spec, row_spec],
        ),
        compiler_params=pltpu.CompilerParams(
            dimension_semantics=("parallel", "parallel", "arbitrary")),
    )(x, t)

    # final (tiny) reductions in plain JAX
    I = jnp.sum(i_out, axis=(0, 1, 3, 4))     # (C,)
    Pc = jnp.sum(p_out, axis=(0, 1, 3, 4))    # (C,)
    Tc = jnp.sum(c_out, axis=(0, 1, 3, 4))    # (C,)
    focal_sum = jnp.sum(f_out)
    n_valid = jnp.sum(v_out)

    # foreground ("loc") dice sums, derived exactly from the class sums:
    #   a = sum_valid (1 - p0)          = n_valid - P0
    #   b = sum_valid [t > 0]           = n_valid - T0
    #   i = sum_valid (1 - p0)*[t > 0]  = b - P0 + I0
    a_sum = n_valid - Pc[0]
    b_sum = n_valid - Tc[0]
    i0_sum = b_sum - Pc[0] + I[0]

    # NLLLoss2d(weight=None, size_average=True, ignore_index): mean over valid pixels of -x_t
    ce_loss = -focal_sum / n_valid

    # soft_dice_loss_mc (per_image=False, ohpm=False, only_existing_classes=False)
    per_cls = jnp.where(Tc[1:] > MIN_CLASS_PIXELS,
                        1.0 - (2.0 * I[1:] + EPS5) / (Pc[1:] + Tc[1:] + EPS5),
                        0.0)
    d_loss = jnp.sum(per_cls) / (num_classes - 1)

    # soft_dice_loss(1 - probas[:,0][valid], (targets[valid] > 0).float())
    loc = 1.0 - (2.0 * i0_sum + EPS6) / (a_sum + b_sum + EPS6)

    return ce_weight * ce_loss + d_weight * d_loss + d_weight * loc


def _reference(logits, targets, num_classes, gamma=2.0, ce_w=1.0, d_w=0.1):
    """Pure-JAX reference mirroring the PyTorch forward (ohpm=False)."""
    probas = jax.nn.softmax(logits, axis=1)
    logprob = jax.nn.log_softmax(logits, axis=1)
    B, C, H, W = logits.shape
    valid = targets != IGNORE_INDEX
    vf = valid.astype(jnp.float32)
    t_safe = jnp.where(valid, targets, 0)
    onehot = jax.nn.one_hot(t_safe, C, axis=1)
    p_t = jnp.sum(probas * onehot, axis=1)
    lp_t = jnp.sum(logprob * onehot, axis=1)
    ce = -jnp.sum(((1.0 - p_t) ** gamma) * lp_t * vf) / jnp.sum(vf)

    d = 0.0
    for cls in range(1, num_classes):
        tgt = ((targets == cls) & valid).astype(jnp.float32)
        out_c = probas[:, cls] * vf
        inter = jnp.sum(out_c * tgt)
        tsum = jnp.sum(tgt)
        osum = jnp.sum(out_c)
        d = d + jnp.where(tsum > MIN_CLASS_PIXELS,
                          1.0 - (2.0 * inter + EPS5) / (osum + tsum + EPS5), 0.0)
    d = d / (num_classes - 1)

    p0 = probas[:, 0]
    fg = ((targets > 0) & valid).astype(jnp.float32)
    a_sum = jnp.sum((1.0 - p0) * vf)
    b_sum = jnp.sum(fg)
    i0 = jnp.sum((1.0 - p0) * fg)
    loc = 1.0 - (2.0 * i0 + EPS6) / (a_sum + b_sum + EPS6)
    return ce_w * ce + d_w * d + d_w * loc


if __name__ == "__main__":
    # Module config (deterministic, synthetic): num_classes=4, gamma=2,
    # ce_weight=1.0, d_weight=0.1, ohpm=False, no class weights.
    num_classes = 4
    B, C, H, W = 2, num_classes, 16, 16

    key = jax.random.PRNGKey(0)
    k1, k2, k3 = jax.random.split(key, 3)
    logits = jax.random.normal(k1, (B, C, H, W), dtype=jnp.float32)
    targets = jax.random.randint(k2, (B, H, W), 0, num_classes, dtype=jnp.int32)
    # sprinkle some ignored pixels
    ignore_mask = jax.random.uniform(k3, (B, H, W)) < 0.1
    targets = jnp.where(ignore_mask, IGNORE_INDEX, targets)

    loss = focal_loss_with_dice(logits, targets, num_classes=num_classes,
                                gamma=2.0, ce_weight=1.0, d_weight=0.1)
    loss = jax.block_until_ready(loss)

    ref = jax.block_until_ready(_reference(logits, targets, num_classes))
    assert jnp.isfinite(loss), "kernel produced non-finite loss"
    # slightly looser tolerance than exact math: the kernel softmax uses the EUP's
    # approximate reciprocal (pl.reciprocal(approx=True)).
    assert jnp.allclose(loss, ref, rtol=1e-3, atol=1e-4), (loss, ref)

    print("KERNEL_OK")
</pallas_src>

<mosaic_0001>
module attributes {stable_mosaic.version = 11 : i64} {
  func.func @_focal_dice_kernel(%arg0: i32, %arg1: i32, %arg2: i32, %arg3: memref<1x4x8x128xf32, #tpu.memory_space<vmem>>, %arg4: memref<1x1x8x128xi32, #tpu.memory_space<vmem>>, %arg5: memref<1x1x4x8x128xf32, #tpu.memory_space<vmem>>, %arg6: memref<1x1x4x8x128xf32, #tpu.memory_space<vmem>>, %arg7: memref<1x1x4x8x128xf32, #tpu.memory_space<vmem>>, %arg8: memref<1x1x1x8x128xf32, #tpu.memory_space<vmem>>, %arg9: memref<1x1x1x8x128xf32, #tpu.memory_space<vmem>>) attributes {dimension_semantics = [#tpu.dimension_semantics<parallel>, #tpu.dimension_semantics<parallel>, #tpu.dimension_semantics<arbitrary>], iteration_bounds = array<i64: 2, 1, 1>, scalar_prefetch = 0 : i64, scratch_operands = 0 : i64, tpu.core_type = #tpu.core_type<tc>, window_params = [{transform_indices = @transform_0, window_bounds = array<i64: 1, 4, 8, 128>}, {transform_indices = @transform_1, window_bounds = array<i64: 1, 1, 8, 128>}, {transform_indices = @transform_2, window_bounds = array<i64: 1, 1, 4, 8, 128>}, {transform_indices = @transform_3, window_bounds = array<i64: 1, 1, 4, 8, 128>}, {transform_indices = @transform_4, window_bounds = array<i64: 1, 1, 4, 8, 128>}, {transform_indices = @transform_5, window_bounds = array<i64: 1, 1, 1, 8, 128>}, {transform_indices = @transform_6, window_bounds = array<i64: 1, 1, 1, 8, 128>}]} {
    %c0_i32 = arith.constant 0 : i32
    %0 = arith.cmpi eq, %arg2, %c0_i32 : i32
    %1 = arith.extui %0 : i1 to i32
    %c0_i32_0 = arith.constant 0 : i32
    %2 = arith.cmpi ne, %1, %c0_i32_0 : i32
    scf.if %2 {
      %cst_156 = arith.constant 0.000000e+00 : f32
      %178 = vector.broadcast %cst_156 : f32 to vector<4x8x128xf32>
      %c0_157 = arith.constant 0 : index
      %c0_158 = arith.constant 0 : index
      %c0_159 = arith.constant 0 : index
      %c0_160 = arith.constant 0 : index
      %c0_161 = arith.constant 0 : index
      %179 = vector.load %arg5[%c0_157, %c0_158, %c0_159, %c0_160, %c0_161] : memref<1x1x4x8x128xf32, #tpu.memory_space<vmem>>, vector<1x1x4x8x128xf32>
      %180 = vector.shape_cast %179 : vector<1x1x4x8x128xf32> to vector<4x8x128xf32>
      %181 = vector.shape_cast %178 : vector<4x8x128xf32> to vector<1x1x4x8x128xf32>
      tpu.vector_store %arg5[%c0_157, %c0_158, %c0_159, %c0_160, %c0_161], %181 {strides = array<i32>} : memref<1x1x4x8x128xf32, #tpu.memory_space<vmem>>, vector<1x1x4x8x128xf32>,
      %cst_162 = arith.constant 0.000000e+00 : f32
      %182 = vector.broadcast %cst_162 : f32 to vector<4x8x128xf32>
      %c0_163 = arith.constant 0 : index
      %c0_164 = arith.constant 0 : index
      %c0_165 = arith.constant 0 : index
      %c0_166 = arith.constant 0 : index
      %c0_167 = arith.constant 0 : index
      %183 = vector.load %arg6[%c0_163, %c0_164, %c0_165, %c0_166, %c0_167] : memref<1x1x4x8x128xf32, #tpu.memory_space<vmem>>, vector<1x1x4x8x128xf32>
      %184 = vector.shape_cast %183 : vector<1x1x4x8x128xf32> to vector<4x8x128xf32>
      %185 = vector.shape_cast %182 : vector<4x8x128xf32> to vector<1x1x4x8x128xf32>
      tpu.vector_store %arg6[%c0_163, %c0_164, %c0_165, %c0_166, %c0_167], %185 {strides = array<i32>} : memref<1x1x4x8x128xf32, #tpu.memory_space<vmem>>, vector<1x1x4x8x128xf32>,
      %cst_168 = arith.constant 0.000000e+00 : f32
      %186 = vector.broadcast %cst_168 : f32 to vector<4x8x128xf32>
      %c0_169 = arith.constant 0 : index
      %c0_170 = arith.constant 0 : index
      %c0_171 = arith.constant 0 : index
      %c0_172 = arith.constant 0 : index
      %c0_173 = arith.constant 0 : index
      %187 = vector.load %arg7[%c0_169, %c0_170, %c0_171, %c0_172, %c0_173] : memref<1x1x4x8x128xf32, #tpu.memory_space<vmem>>, vector<1x1x4x8x128xf32>
      %188 = vector.shape_cast %187 : vector<1x1x4x8x128xf32> to vector<4x8x128xf32>
      %189 = vector.shape_cast %186 : vector<4x8x128xf32> to vector<1x1x4x8x128xf32>
      tpu.vector_store %arg7[%c0_169, %c0_170, %c0_171, %c0_172, %c0_173], %189 {strides = array<i32>} : memref<1x1x4x8x128xf32, #tpu.memory_space<vmem>>, vector<1x1x4x8x128xf32>,
      %cst_174 = arith.constant 0.000000e+00 : f32
      %190 = vector.broadcast %cst_174 : f32 to vector<1x8x128xf32>
      %c0_175 = arith.constant 0 : index
      %c0_176 = arith.constant 0 : index
      %c0_177 = arith.constant 0 : index
      %c0_178 = arith.constant 0 : index
      %c0_179 = arith.constant 0 : index
      %191 = vector.load %arg8[%c0_175, %c0_176, %c0_177, %c0_178, %c0_179] : memref<1x1x1x8x128xf32, #tpu.memory_space<vmem>>, vector<1x1x1x8x128xf32>
      %192 = vector.shape_cast %191 : vector<1x1x1x8x128xf32> to vector<1x8x128xf32>
      %193 = vector.shape_cast %190 : vector<1x8x128xf32> to vector<1x1x1x8x128xf32>
      tpu.vector_store %arg8[%c0_175, %c0_176, %c0_177, %c0_178, %c0_179], %193 {strides = array<i32>} : memref<1x1x1x8x128xf32, #tpu.memory_space<vmem>>, vector<1x1x1x8x128xf32>,
      %cst_180 = arith.constant 0.000000e+00 : f32
      %194 = vector.broadcast %cst_180 : f32 to vector<1x8x128xf32>
      %c0_181 = arith.constant 0 : index
      %c0_182 = arith.constant 0 : index
      %c0_183 = arith.constant 0 : index
      %c0_184 = arith.constant 0 : index
      %c0_185 = arith.constant 0 : index
      %195 = vector.load %arg9[%c0_181, %c0_182, %c0_183, %c0_184, %c0_185] : memref<1x1x1x8x128xf32, #tpu.memory_space<vmem>>, vector<1x1x1x8x128xf32>
      %196 = vector.shape_cast %195 : vector<1x1x1x8x128xf32> to vector<1x8x128xf32>
      %197 = vector.shape_cast %194 : vector<1x8x128xf32> to vector<1x1x1x8x128xf32>
      tpu.vector_store %arg9[%c0_181, %c0_182, %c0_183, %c0_184, %c0_185], %197 {strides = array<i32>} : memref<1x1x1x8x128xf32, #tpu.memory_space<vmem>>, vector<1x1x1x8x128xf32>,
    } else {
    }
    %c0 = arith.constant 0 : index
    %c0_1 = arith.constant 0 : index
    %c0_2 = arith.constant 0 : index
    %c0_3 = arith.constant 0 : index
    %c0_4 = arith.constant 0 : index
    %3 = vector.load %arg5[%c0, %c0_1, %c0_2, %c0_3, %c0_4] : memref<1x1x4x8x128xf32, #tpu.memory_space<vmem>>, vector<1x1x1x8x128xf32>
    %4 = vector.shape_cast %3 : vector<1x1x1x8x128xf32> to vector<8x128xf32>
    %c0_5 = arith.constant 0 : index
    %c0_6 = arith.constant 0 : index
    %c1 = arith.constant 1 : index
    %c0_7 = arith.constant 0 : index
    %c0_8 = arith.constant 0 : index
    %5 = vector.load %arg5[%c0_5, %c0_6, %c1, %c0_7, %c0_8] : memref<1x1x4x8x128xf32, #tpu.memory_space<vmem>>, vector<1x1x1x8x128xf32>
    %6 = vector.shape_cast %5 : vector<1x1x1x8x128xf32> to vector<8x128xf32>
    %c0_9 = arith.constant 0 : index
    %c0_10 = arith.constant 0 : index
    %c2 = arith.constant 2 : index
    %c0_11 = arith.constant 0 : index
    %c0_12 = arith.constant 0 : index
    %7 = vector.load %arg5[%c0_9, %c0_10, %c2, %c0_11, %c0_12] : memref<1x1x4x8x128xf32, #tpu.memory_space<vmem>>, vector<1x1x1x8x128xf32>
    %8 = vector.shape_cast %7 : vector<1x1x1x8x128xf32> to vector<8x128xf32>
    %c0_13 = arith.constant 0 : index
    %c0_14 = arith.constant 0 : index
    %c3 = arith.constant 3 : index
    %c0_15 = arith.constant 0 : index
    %c0_16 = arith.constant 0 : index
    %9 = vector.load %arg5[%c0_13, %c0_14, %c3, %c0_15, %c0_16] : memref<1x1x4x8x128xf32, #tpu.memory_space<vmem>>, vector<1x1x1x8x128xf32>
    %10 = vector.shape_cast %9 : vector<1x1x1x8x128xf32> to vector<8x128xf32>
    %c0_17 = arith.constant 0 : index
    %c0_18 = arith.constant 0 : index
    %c0_19 = arith.constant 0 : index
    %c0_20 = arith.constant 0 : index
    %c0_21 = arith.constant 0 : index
    %11 = vector.load %arg6[%c0_17, %c0_18, %c0_19, %c0_20, %c0_21] : memref<1x1x4x8x128xf32, #tpu.memory_space<vmem>>, vector<1x1x1x8x128xf32>
    %12 = vector.shape_cast %11 : vector<1x1x1x8x128xf32> to vector<8x128xf32>
    %c0_22 = arith.constant 0 : index
    %c0_23 = arith.constant 0 : index
    %c1_24 = arith.constant 1 : index
    %c0_25 = arith.constant 0 : index
    %c0_26 = arith.constant 0 : index
    %13 = vector.load %arg6[%c0_22, %c0_23, %c1_24, %c0_25, %c0_26] : memref<1x1x4x8x128xf32, #tpu.memory_space<vmem>>, vector<1x1x1x8x128xf32>
    %14 = vector.shape_cast %13 : vector<1x1x1x8x128xf32> to vector<8x128xf32>
    %c0_27 = arith.constant 0 : index
    %c0_28 = arith.constant 0 : index
    %c2_29 = arith.constant 2 : index
    %c0_30 = arith.constant 0 : index
    %c0_31 = arith.constant 0 : index
    %15 = vector.load %arg6[%c0_27, %c0_28, %c2_29, %c0_30, %c0_31] : memref<1x1x4x8x128xf32, #tpu.memory_space<vmem>>, vector<1x1x1x8x128xf32>
    %16 = vector.shape_cast %15 : vector<1x1x1x8x128xf32> to vector<8x128xf32>
    %c0_32 = arith.constant 0 : index
    %c0_33 = arith.constant 0 : index
    %c3_34 = arith.constant 3 : index
    %c0_35 = arith.constant 0 : index
    %c0_36 = arith.constant 0 : index
    %17 = vector.load %arg6[%c0_32, %c0_33, %c3_34, %c0_35, %c0_36] : memref<1x1x4x8x128xf32, #tpu.memory_space<vmem>>, vector<1x1x1x8x128xf32>
    %18 = vector.shape_cast %17 : vector<1x1x1x8x128xf32> to vector<8x128xf32>
    %c0_37 = arith.constant 0 : index
    %c0_38 = arith.constant 0 : index
    %c0_39 = arith.constant 0 : index
    %c0_40 = arith.constant 0 : index
    %c0_41 = arith.constant 0 : index
    %19 = vector.load %arg7[%c0_37, %c0_38, %c0_39, %c0_40, %c0_41] : memref<1x1x4x8x128xf32, #tpu.memory_space<vmem>>, vector<1x1x1x8x128xf32>
    %20 = vector.shape_cast %19 : vector<1x1x1x8x128xf32> to vector<8x128xf32>
    %c0_42 = arith.constant 0 : index
    %c0_43 = arith.constant 0 : index
    %c1_44 = arith.constant 1 : index
    %c0_45 = arith.constant 0 : index
    %c0_46 = arith.constant 0 : index
    %21 = vector.load %arg7[%c0_42, %c0_43, %c1_44, %c0_45, %c0_46] : memref<1x1x4x8x128xf32, #tpu.memory_space<vmem>>, vector<1x1x1x8x128xf32>
    %22 = vector.shape_cast %21 : vector<1x1x1x8x128xf32> to vector<8x128xf32>
    %c0_47 = arith.constant 0 : index
    %c0_48 = arith.constant 0 : index
    %c2_49 = arith.constant 2 : index
    %c0_50 = arith.constant 0 : index
    %c0_51 = arith.constant 0 : index
    %23 = vector.load %arg7[%c0_47, %c0_48, %c2_49, %c0_50, %c0_51] : memref<1x1x4x8x128xf32, #tpu.memory_space<vmem>>, vector<1x1x1x8x128xf32>
    %24 = vector.shape_cast %23 : vector<1x1x1x8x128xf32> to vector<8x128xf32>
    %c0_52 = arith.constant 0 : index
    %c0_53 = arith.constant 0 : index
    %c3_54 = arith.constant 3 : index
    %c0_55 = arith.constant 0 : index
    %c0_56 = arith.constant 0 : index
    %25 = vector.load %arg7[%c0_52, %c0_53, %c3_54, %c0_55, %c0_56] : memref<1x1x4x8x128xf32, #tpu.memory_space<vmem>>, vector<1x1x1x8x128xf32>
    %26 = vector.shape_cast %25 : vector<1x1x1x8x128xf32> to vector<8x128xf32>
    %c0_57 = arith.constant 0 : index
    %c0_58 = arith.constant 0 : index
    %c0_59 = arith.constant 0 : index
    %c0_60 = arith.constant 0 : index
    %c0_61 = arith.constant 0 : index
    %27 = vector.load %arg8[%c0_57, %c0_58, %c0_59, %c0_60, %c0_61] : memref<1x1x1x8x128xf32, #tpu.memory_space<vmem>>, vector<1x1x1x8x128xf32>
    %28 = vector.shape_cast %27 : vector<1x1x1x8x128xf32> to vector<8x128xf32>
    %c0_62 = arith.constant 0 : index
    %c0_63 = arith.constant 0 : index
    %c0_64 = arith.constant 0 : index
    %c0_65 = arith.constant 0 : index
    %c0_66 = arith.constant 0 : index
    %29 = vector.load %arg9[%c0_62, %c0_63, %c0_64, %c0_65, %c0_66] : memref<1x1x1x8x128xf32, #tpu.memory_space<vmem>>, vector<1x1x1x8x128xf32>
    %30 = vector.shape_cast %29 : vector<1x1x1x8x128xf32> to vector<8x128xf32>
    %c0_i32_67 = arith.constant 0 : i32
    %c8_i32 = arith.constant 8 : i32
    %31 = arith.muli %c0_i32_67, %c8_i32 : i32
    %32 = tpu.assume_multiple %31, 8 : i32
    %c0_68 = arith.constant 0 : index
    %c0_69 = arith.constant 0 : index
    %33 = arith.index_cast %32 : i32 to index
    %c0_70 = arith.constant 0 : index
    %34 = vector.load %arg3[%c0_68, %c0_69, %33, %c0_70] : memref<1x4x8x128xf32, #tpu.memory_space<vmem>>, vector<1x1x8x128xf32>
    %35 = vector.shape_cast %34 : vector<1x1x8x128xf32> to vector<8x128xf32>
    %c0_71 = arith.constant 0 : index
    %c1_72 = arith.constant 1 : index
    %36 = arith.index_cast %32 : i32 to index
    %c0_73 = arith.constant 0 : index
    %37 = vector.load %arg3[%c0_71, %c1_72, %36, %c0_73] : memref<1x4x8x128xf32, #tpu.memory_space<vmem>>, vector<1x1x8x128xf32>
    %38 = vector.shape_cast %37 : vector<1x1x8x128xf32> to vector<8x128xf32>
    %c0_74 = arith.constant 0 : index
    %c2_75 = arith.constant 2 : index
    %39 = arith.index_cast %32 : i32 to index
    %c0_76 = arith.constant 0 : index
    %40 = vector.load %arg3[%c0_74, %c2_75, %39, %c0_76] : memref<1x4x8x128xf32, #tpu.memory_space<vmem>>, vector<1x1x8x128xf32>
    %41 = vector.shape_cast %40 : vector<1x1x8x128xf32> to vector<8x128xf32>
    %c0_77 = arith.constant 0 : index
    %c3_78 = arith.constant 3 : index
    %42 = arith.index_cast %32 : i32 to index
    %c0_79 = arith.constant 0 : index
    %43 = vector.load %arg3[%c0_77, %c3_78, %42, %c0_79] : memref<1x4x8x128xf32, #tpu.memory_space<vmem>>, vector<1x1x8x128xf32>
    %44 = vector.shape_cast %43 : vector<1x1x8x128xf32> to vector<8x128xf32>
    %c0_80 = arith.constant 0 : index
    %c0_81 = arith.constant 0 : index
    %45 = arith.index_cast %32 : i32 to index
    %c0_82 = arith.constant 0 : index
    %46 = vector.load %arg4[%c0_80, %c0_81, %45, %c0_82] : memref<1x1x8x128xi32, #tpu.memory_space<vmem>>, vector<1x1x8x128xi32>
    %47 = vector.shape_cast %46 : vector<1x1x8x128xi32> to vector<8x128xi32>
    %48 = arith.maximumf %35, %38 : vector<8x128xf32>
    %49 = arith.maximumf %48, %41 : vector<8x128xf32>
    %50 = arith.maximumf %49, %44 : vector<8x128xf32>
    %51 = arith.subf %35, %50 : vector<8x128xf32>
    %52 = math.exp %51 : vector<8x128xf32>
    %53 = arith.subf %38, %50 : vector<8x128xf32>
    %54 = math.exp %53 : vector<8x128xf32>
    %55 = arith.subf %41, %50 : vector<8x128xf32>
    %56 = math.exp %55 : vector<8x128xf32>
    %57 = arith.subf %44, %50 : vector<8x128xf32>
    %58 = math.exp %57 : vector<8x128xf32>
    %59 = arith.addf %52, %54 : vector<8x128xf32>
    %60 = arith.addf %59, %56 : vector<8x128xf32>
    %61 = arith.addf %60, %58 : vector<8x128xf32>
    %62 = tpu.reciprocal %61 {approx = true} : vector<8x128xf32> -> vector<8x128xf32>
    %63 = arith.mulf %52, %62 : vector<8x128xf32>
    %64 = arith.mulf %54, %62 : vector<8x128xf32>
    %65 = arith.mulf %56, %62 : vector<8x128xf32>
    %66 = arith.mulf %58, %62 : vector<8x128xf32>
    %67 = math.log %61 : vector<8x128xf32>
    %c255_i32 = arith.constant 255 : i32
    %68 = vector.broadcast %c255_i32 : i32 to vector<8x128xi32>
    %69 = arith.cmpi ne, %47, %68 : vector<8x128xi32>
    %70 = arith.extui %69 : vector<8x128xi1> to vector<8x128xi32>
    %71 = arith.sitofp %70 : vector<8x128xi32> to vector<8x128xf32>
    %c0_i32_83 = arith.constant 0 : i32
    %72 = vector.broadcast %c0_i32_83 : i32 to vector<8x128xi32>
    %73 = arith.cmpi eq, %47, %72 : vector<8x128xi32>
    %74 = arith.extui %73 : vector<8x128xi1> to vector<8x128xi32>
    %75 = arith.sitofp %74 : vector<8x128xi32> to vector<8x128xf32>
    %c1_i32 = arith.constant 1 : i32
    %76 = vector.broadcast %c1_i32 : i32 to vector<8x128xi32>
    %77 = arith.cmpi eq, %47, %76 : vector<8x128xi32>
    %78 = arith.extui %77 : vector<8x128xi1> to vector<8x128xi32>
    %79 = arith.sitofp %78 : vector<8x128xi32> to vector<8x128xf32>
    %c2_i32 = arith.constant 2 : i32
    %80 = vector.broadcast %c2_i32 : i32 to vector<8x128xi32>
    %81 = arith.cmpi eq, %47, %80 : vector<8x128xi32>
    %82 = arith.extui %81 : vector<8x128xi1> to vector<8x128xi32>
    %83 = arith.sitofp %82 : vector<8x128xi32> to vector<8x128xf32>
    %c3_i32 = arith.constant 3 : i32
    %84 = vector.broadcast %c3_i32 : i32 to vector<8x128xi32>
    %85 = arith.cmpi eq, %47, %84 : vector<8x128xi32>
    %86 = arith.extui %85 : vector<8x128xi1> to vector<8x128xi32>
    %87 = arith.sitofp %86 : vector<8x128xi32> to vector<8x128xf32>
    %88 = arith.subf %35, %50 : vector<8x128xf32>
    %89 = arith.mulf %75, %88 : vector<8x128xf32>
    %90 = arith.mulf %75, %63 : vector<8x128xf32>
    %91 = arith.subf %38, %50 : vector<8x128xf32>
    %92 = arith.mulf %79, %91 : vector<8x128xf32>
    %93 = arith.addf %89, %92 : vector<8x128xf32>
    %94 = arith.mulf %79, %64 : vector<8x128xf32>
    %95 = arith.addf %90, %94 : vector<8x128xf32>
    %96 = arith.subf %41, %50 : vector<8x128xf32>
    %97 = arith.mulf %83, %96 : vector<8x128xf32>
    %98 = arith.addf %93, %97 : vector<8x128xf32>
    %99 = arith.mulf %83, %65 : vector<8x128xf32>
    %100 = arith.addf %95, %99 : vector<8x128xf32>
    %101 = arith.subf %44, %50 : vector<8x128xf32>
    %102 = arith.mulf %87, %101 : vector<8x128xf32>
    %103 = arith.addf %98, %102 : vector<8x128xf32>
    %104 = arith.mulf %87, %66 : vector<8x128xf32>
    %105 = arith.addf %100, %104 : vector<8x128xf32>
    %106 = arith.subf %103, %67 : vector<8x128xf32>
    %cst = arith.constant 1.000000e+00 : f32
    %107 = vector.broadcast %cst : f32 to vector<8x128xf32>
    %108 = arith.subf %107, %105 : vector<8x128xf32>
    %cst_84 = arith.constant 0.000000e+00 : f32
    %109 = vector.broadcast %cst_84 : f32 to vector<8x128xf32>
    %110 = arith.maximumf %108, %109 : vector<8x128xf32>
    %111 = arith.mulf %110, %110 : vector<8x128xf32>
    %112 = arith.mulf %111, %106 : vector<8x128xf32>
    %113 = arith.mulf %112, %71 : vector<8x128xf32>
    %114 = arith.mulf %63, %75 : vector<8x128xf32>
    %115 = arith.addf %4, %114 : vector<8x128xf32>
    %116 = arith.mulf %64, %79 : vector<8x128xf32>
    %117 = arith.addf %6, %116 : vector<8x128xf32>
    %118 = arith.mulf %65, %83 : vector<8x128xf32>
    %119 = arith.addf %8, %118 : vector<8x128xf32>
    %120 = arith.mulf %66, %87 : vector<8x128xf32>
    %121 = arith.addf %10, %120 : vector<8x128xf32>
    %122 = arith.mulf %63, %71 : vector<8x128xf32>
    %123 = arith.addf %12, %122 : vector<8x128xf32>
    %124 = arith.mulf %64, %71 : vector<8x128xf32>
    %125 = arith.addf %14, %124 : vector<8x128xf32>
    %126 = arith.mulf %65, %71 : vector<8x128xf32>
    %127 = arith.addf %16, %126 : vector<8x128xf32>
    %128 = arith.mulf %66, %71 : vector<8x128xf32>
    %129 = arith.addf %18, %128 : vector<8x128xf32>
    %130 = arith.addf %20, %75 : vector<8x128xf32>
    %131 = arith.addf %22, %79 : vector<8x128xf32>
    %132 = arith.addf %24, %83 : vector<8x128xf32>
    %133 = arith.addf %26, %87 : vector<8x128xf32>
    %134 = arith.addf %28, %113 : vector<8x128xf32>
    %135 = arith.addf %30, %71 : vector<8x128xf32>
    %c1_i32_85 = arith.constant 1 : i32
    %c0_86 = arith.constant 0 : index
    %c0_87 = arith.constant 0 : index
    %c0_88 = arith.constant 0 : index
    %c0_89 = arith.constant 0 : index
    %c0_90 = arith.constant 0 : index
    %136 = vector.load %arg5[%c0_86, %c0_87, %c0_88, %c0_89, %c0_90] : memref<1x1x4x8x128xf32, #tpu.memory_space<vmem>>, vector<1x1x1x8x128xf32>
    %137 = vector.shape_cast %136 : vector<1x1x1x8x128xf32> to vector<8x128xf32>
    %138 = vector.shape_cast %115 : vector<8x128xf32> to vector<1x1x1x8x128xf32>
    tpu.vector_store %arg5[%c0_86, %c0_87, %c0_88, %c0_89, %c0_90], %138 {strides = array<i32>} : memref<1x1x4x8x128xf32, #tpu.memory_space<vmem>>, vector<1x1x1x8x128xf32>,
    %c0_91 = arith.constant 0 : index
    %c0_92 = arith.constant 0 : index
    %c0_93 = arith.constant 0 : index
    %c0_94 = arith.constant 0 : index
    %c0_95 = arith.constant 0 : index
    %139 = vector.load %arg6[%c0_91, %c0_92, %c0_93, %c0_94, %c0_95] : memref<1x1x4x8x128xf32, #tpu.memory_space<vmem>>, vector<1x1x1x8x128xf32>
    %140 = vector.shape_cast %139 : vector<1x1x1x8x128xf32> to vector<8x128xf32>
    %141 = vector.shape_cast %123 : vector<8x128xf32> to vector<1x1x1x8x128xf32>
    tpu.vector_store %arg6[%c0_91, %c0_92, %c0_93, %c0_94, %c0_95], %141 {strides = array<i32>} : memref<1x1x4x8x128xf32, #tpu.memory_space<vmem>>, vector<1x1x1x8x128xf32>,
    %c0_96 = arith.constant 0 : index
    %c0_97 = arith.constant 0 : index
    %c0_98 = arith.constant 0 : index
    %c0_99 = arith.constant 0 : index
    %c0_100 = arith.constant 0 : index
    %142 = vector.load %arg7[%c0_96, %c0_97, %c0_98, %c0_99, %c0_100] : memref<1x1x4x8x128xf32, #tpu.memory_space<vmem>>, vector<1x1x1x8x128xf32>
    %143 = vector.shape_cast %142 : vector<1x1x1x8x128xf32> to vector<8x128xf32>
    %144 = vector.shape_cast %130 : vector<8x128xf32> to vector<1x1x1x8x128xf32>
    tpu.vector_store %arg7[%c0_96, %c0_97, %c0_98, %c0_99, %c0_100], %144 {strides = array<i32>} : memref<1x1x4x8x128xf32, #tpu.memory_space<vmem>>, vector<1x1x1x8x128xf32>,
    %c0_101 = arith.constant 0 : index
    %c0_102 = arith.constant 0 : index
    %c1_103 = arith.constant 1 : index
    %c0_104 = arith.constant 0 : index
    %c0_105 = arith.constant 0 : index
    %145 = vector.load %arg5[%c0_101, %c0_102, %c1_103, %c0_104, %c0_105] : memref<1x1x4x8x128xf32, #tpu.memory_space<vmem>>, vector<1x1x1x8x128xf32>
    %146 = vector.shape_cast %145 : vector<1x1x1x8x128xf32> to vector<8x128xf32>
    %147 = vector.shape_cast %117 : vector<8x128xf32> to vector<1x1x1x8x128xf32>
    tpu.vector_store %arg5[%c0_101, %c0_102, %c1_103, %c0_104, %c0_105], %147 {strides = array<i32>} : memref<1x1x4x8x128xf32, #tpu.memory_space<vmem>>, vector<1x1x1x8x128xf32>,
    %c0_106 = arith.constant 0 : index
    %c0_107 = arith.constant 0 : index
    %c1_108 = arith.constant 1 : index
    %c0_109 = arith.constant 0 : index
    %c0_110 = arith.constant 0 : index
    %148 = vector.load %arg6[%c0_106, %c0_107, %c1_108, %c0_109, %c0_110] : memref<1x1x4x8x128xf32, #tpu.memory_space<vmem>>, vector<1x1x1x8x128xf32>
    %149 = vector.shape_cast %148 : vector<1x1x1x8x128xf32> to vector<8x128xf32>
    %150 = vector.shape_cast %125 : vector<8x128xf32> to vector<1x1x1x8x128xf32>
    tpu.vector_store %arg6[%c0_106, %c0_107, %c1_108, %c0_109, %c0_110], %150 {strides = array<i32>} : memref<1x1x4x8x128xf32, #tpu.memory_space<vmem>>, vector<1x1x1x8x128xf32>,
    %c0_111 = arith.constant 0 : index
    %c0_112 = arith.constant 0 : index
    %c1_113 = arith.constant 1 : index
    %c0_114 = arith.constant 0 : index
    %c0_115 = arith.constant 0 : index
    %151 = vector.load %arg7[%c0_111, %c0_112, %c1_113, %c0_114, %c0_115] : memref<1x1x4x8x128xf32, #tpu.memory_space<vmem>>, vector<1x1x1x8x128xf32>
    %152 = vector.shape_cast %151 : vector<1x1x1x8x128xf32> to vector<8x128xf32>
    %153 = vector.shape_cast %131 : vector<8x128xf32> to vector<1x1x1x8x128xf32>
    tpu.vector_store %arg7[%c0_111, %c0_112, %c1_113, %c0_114, %c0_115], %153 {strides = array<i32>} : memref<1x1x4x8x128xf32, #tpu.memory_space<vmem>>, vector<1x1x1x8x128xf32>,
    %c0_116 = arith.constant 0 : index
    %c0_117 = arith.constant 0 : index
    %c2_118 = arith.constant 2 : index
    %c0_119 = arith.constant 0 : index
    %c0_120 = arith.constant 0 : index
    %154 = vector.load %arg5[%c0_116, %c0_117, %c2_118, %c0_119, %c0_120] : memref<1x1x4x8x128xf32, #tpu.memory_space<vmem>>, vector<1x1x1x8x128xf32>
    %155 = vector.shape_cast %154 : vector<1x1x1x8x128xf32> to vector<8x128xf32>
    %156 = vector.shape_cast %119 : vector<8x128xf32> to vector<1x1x1x8x128xf32>
    tpu.vector_store %arg5[%c0_116, %c0_117, %c2_118, %c0_119, %c0_120], %156 {strides = array<i32>} : memref<1x1x4x8x128xf32, #tpu.memory_space<vmem>>, vector<1x1x1x8x128xf32>,
    %c0_121 = arith.constant 0 : index
    %c0_122 = arith.constant 0 : index
    %c2_123 = arith.constant 2 : index
    %c0_124 = arith.constant 0 : index
    %c0_125 = arith.constant 0 : index
    %157 = vector.load %arg6[%c0_121, %c0_122, %c2_123, %c0_124, %c0_125] : memref<1x1x4x8x128xf32, #tpu.memory_space<vmem>>, vector<1x1x1x8x128xf32>
    %158 = vector.shape_cast %157 : vector<1x1x1x8x128xf32> to vector<8x128xf32>
    %159 = vector.shape_cast %127 : vector<8x128xf32> to vector<1x1x1x8x128xf32>
    tpu.vector_store %arg6[%c0_121, %c0_122, %c2_123, %c0_124, %c0_125], %159 {strides = array<i32>} : memref<1x1x4x8x128xf32, #tpu.memory_space<vmem>>, vector<1x1x1x8x128xf32>,
    %c0_126 = arith.constant 0 : index
    %c0_127 = arith.constant 0 : index
    %c2_128 = arith.constant 2 : index
    %c0_129 = arith.constant 0 : index
    %c0_130 = arith.constant 0 : index
    %160 = vector.load %arg7[%c0_126, %c0_127, %c2_128, %c0_129, %c0_130] : memref<1x1x4x8x128xf32, #tpu.memory_space<vmem>>, vector<1x1x1x8x128xf32>
    %161 = vector.shape_cast %160 : vector<1x1x1x8x128xf32> to vector<8x128xf32>
    %162 = vector.shape_cast %132 : vector<8x128xf32> to vector<1x1x1x8x128xf32>
    tpu.vector_store %arg7[%c0_126, %c0_127, %c2_128, %c0_129, %c0_130], %162 {strides = array<i32>} : memref<1x1x4x8x128xf32, #tpu.memory_space<vmem>>, vector<1x1x1x8x128xf32>,
    %c0_131 = arith.constant 0 : index
    %c0_132 = arith.constant 0 : index
    %c3_133 = arith.constant 3 : index
    %c0_134 = arith.constant 0 : index
    %c0_135 = arith.constant 0 : index
    %163 = vector.load %arg5[%c0_131, %c0_132, %c3_133, %c0_134, %c0_135] : memref<1x1x4x8x128xf32, #tpu.memory_space<vmem>>, vector<1x1x1x8x128xf32>
    %164 = vector.shape_cast %163 : vector<1x1x1x8x128xf32> to vector<8x128xf32>
    %165 = vector.shape_cast %121 : vector<8x128xf32> to vector<1x1x1x8x128xf32>
    tpu.vector_store %arg5[%c0_131, %c0_132, %c3_133, %c0_134, %c0_135], %165 {strides = array<i32>} : memref<1x1x4x8x128xf32, #tpu.memory_space<vmem>>, vector<1x1x1x8x128xf32>,
    %c0_136 = arith.constant 0 : index
    %c0_137 = arith.constant 0 : index
    %c3_138 = arith.constant 3 : index
    %c0_139 = arith.constant 0 : index
    %c0_140 = arith.constant 0 : index
    %166 = vector.load %arg6[%c0_136, %c0_137, %c3_138, %c0_139, %c0_140] : memref<1x1x4x8x128xf32, #tpu.memory_space<vmem>>, vector<1x1x1x8x128xf32>
    %167 = vector.shape_cast %166 : vector<1x1x1x8x128xf32> to vector<8x128xf32>
    %168 = vector.shape_cast %129 : vector<8x128xf32> to vector<1x1x1x8x128xf32>
    tpu.vector_store %arg6[%c0_136, %c0_137, %c3_138, %c0_139, %c0_140], %168 {strides = array<i32>} : memref<1x1x4x8x128xf32, #tpu.memory_space<vmem>>, vector<1x1x1x8x128xf32>,
    %c0_141 = arith.constant 0 : index
    %c0_142 = arith.constant 0 : index
    %c3_143 = arith.constant 3 : index
    %c0_144 = arith.constant 0 : index
    %c0_145 = arith.constant 0 : index
    %169 = vector.load %arg7[%c0_141, %c0_142, %c3_143, %c0_144, %c0_145] : memref<1x1x4x8x128xf32, #tpu.memory_space<vmem>>, vector<1x1x1x8x128xf32>
    %170 = vector.shape_cast %169 : vector<1x1x1x8x128xf32> to vector<8x128xf32>
    %171 = vector.shape_cast %133 : vector<8x128xf32> to vector<1x1x1x8x128xf32>
    tpu.vector_store %arg7[%c0_141, %c0_142, %c3_143, %c0_144, %c0_145], %171 {strides = array<i32>} : memref<1x1x4x8x128xf32, #tpu.memory_space<vmem>>, vector<1x1x1x8x128xf32>,
    %c0_146 = arith.constant 0 : index
    %c0_147 = arith.constant 0 : index
    %c0_148 = arith.constant 0 : index
    %c0_149 = arith.constant 0 : index
    %c0_150 = arith.constant 0 : index
    %172 = vector.load %arg8[%c0_146, %c0_147, %c0_148, %c0_149, %c0_150] : memref<1x1x1x8x128xf32, #tpu.memory_space<vmem>>, vector<1x1x1x8x128xf32>
    %173 = vector.shape_cast %172 : vector<1x1x1x8x128xf32> to vector<8x128xf32>
    %174 = vector.shape_cast %134 : vector<8x128xf32> to vector<1x1x1x8x128xf32>
    tpu.vector_store %arg8[%c0_146, %c0_147, %c0_148, %c0_149, %c0_150], %174 {strides = array<i32>} : memref<1x1x1x8x128xf32, #tpu.memory_space<vmem>>, vector<1x1x1x8x128xf32>,
    %c0_151 = arith.constant 0 : index
    %c0_152 = arith.constant 0 : index
    %c0_153 = arith.constant 0 : index
    %c0_154 = arith.constant 0 : index
    %c0_155 = arith.constant 0 : index
    %175 = vector.load %arg9[%c0_151, %c0_152, %c0_153, %c0_154, %c0_155] : memref<1x1x1x8x128xf32, #tpu.memory_space<vmem>>, vector<1x1x1x8x128xf32>
    %176 = vector.shape_cast %175 : vector<1x1x1x8x128xf32> to vector<8x128xf32>
    %177 = vector.shape_cast %135 : vector<8x128xf32> to vector<1x1x1x8x128xf32>
    tpu.vector_store %arg9[%c0_151, %c0_152, %c0_153, %c0_154, %c0_155], %177 {strides = array<i32>} : memref<1x1x1x8x128xf32, #tpu.memory_space<vmem>>, vector<1x1x1x8x128xf32>,
    return
  }
  func.func @transform_0(%arg0: i32, %arg1: i32, %arg2: i32) -> (i32, i32, i32, i32) {
    %c1_i32 = arith.constant 1 : i32
    %0 = arith.muli %arg1, %c1_i32 : i32
    %1 = arith.addi %0, %arg2 : i32
    %c0_i32 = arith.constant 0 : i32
    %c0_i32_0 = arith.constant 0 : i32
    %c0_i32_1 = arith.constant 0 : i32
    return %arg0, %c0_i32, %1, %c0_i32_0 : i32, i32, i32, i32
  }
  func.func @transform_1(%arg0: i32, %arg1: i32, %arg2: i32) -> (i32, i32, i32, i32) {
    %c1_i32 = arith.constant 1 : i32
    %0 = arith.muli %arg1, %c1_i32 : i32
    %1 = arith.addi %0, %arg2 : i32
    %c0_i32 = arith.constant 0 : i32
    %c0_i32_0 = arith.constant 0 : i32
    %c0_i32_1 = arith.constant 0 : i32
    return %arg0, %c0_i32, %1, %c0_i32_0 : i32, i32, i32, i32
  }
  func.func @transform_2(%arg0: i32, %arg1: i32, %arg2: i32) -> (i32, i32, i32, i32, i32) {
    %c0_i32 = arith.constant 0 : i32
    %c0_i32_0 = arith.constant 0 : i32
    %c0_i32_1 = arith.constant 0 : i32
    %c0_i32_2 = arith.constant 0 : i32
    return %arg0, %arg1, %c0_i32, %c0_i32_0, %c0_i32_1 : i32, i32, i32, i32, i32
  }
  func.func @transform_3(%arg0: i32, %arg1: i32, %arg2: i32) -> (i32, i32, i32, i32, i32) {
    %c0_i32 = arith.constant 0 : i32
    %c0_i32_0 = arith.constant 0 : i32
    %c0_i32_1 = arith.constant 0 : i32
    %c0_i32_2 = arith.constant 0 : i32
    return %arg0, %arg1, %c0_i32, %c0_i32_0, %c0_i32_1 : i32, i32, i32, i32, i32
  }
  func.func @transform_4(%arg0: i32, %arg1: i32, %arg2: i32) -> (i32, i32, i32, i32, i32) {
    %c0_i32 = arith.constant 0 : i32
    %c0_i32_0 = arith.constant 0 : i32
    %c0_i32_1 = arith.constant 0 : i32
    %c0_i32_2 = arith.constant 0 : i32
    return %arg0, %arg1, %c0_i32, %c0_i32_0, %c0_i32_1 : i32, i32, i32, i32, i32
  }
  func.func @transform_5(%arg0: i32, %arg1: i32, %arg2: i32) -> (i32, i32, i32, i32, i32) {
    %c0_i32 = arith.constant 0 : i32
    %c0_i32_0 = arith.constant 0 : i32
    %c0_i32_1 = arith.constant 0 : i32
    %c0_i32_2 = arith.constant 0 : i32
    return %arg0, %arg1, %c0_i32, %c0_i32_0, %c0_i32_1 : i32, i32, i32, i32, i32
  }
  func.func @transform_6(%arg0: i32, %arg1: i32, %arg2: i32) -> (i32, i32, i32, i32, i32) {
    %c0_i32 = arith.constant 0 : i32
    %c0_i32_0 = arith.constant 0 : i32
    %c0_i32_1 = arith.constant 0 : i32
    %c0_i32_2 = arith.constant 0 : i32
    return %arg0, %arg1, %c0_i32, %c0_i32_0, %c0_i32_1 : i32, i32, i32, i32, i32
  }
}

</mosaic_0001>

<bundles_post_ra>
// kernel: tpu_custom_call.1
= control target key start
LH: loop header
LB: loop body
LE: loop exit
PB: predicated region body
PF: predicated region fallthrough
CT: control target
= control target key end

     0   :  { %s1696_s0 = inlined_call_operand.hbm [shape: f32[2,4,8,128], index: 0, kind: input, shape index: {}]   ;;  %s1697_s1 = inlined_call_operand.hbm [shape: s32[2,1,8,128], index: 1, kind: input, shape index: {}]   ;;  %s1698_s2 = inlined_call_operand.hbm [shape: f32[2,1,4,8,128], index: 2, kind: output, shape index: {0}]   ;;  %s1699_s3 = inlined_call_operand.hbm [shape: f32[2,1,4,8,128], index: 3, kind: output, shape index: {1}]   ;;  %s1700_s4 = inlined_call_operand.hbm [shape: f32[2,1,4,8,128], index: 4, kind: output, shape index: {2}]   ;;  %s1701_s5 = inlined_call_operand.hbm [shape: f32[2,1,1,8,128], index: 5, kind: output, shape index: {3}]   ;;  %s1702_s6 = inlined_call_operand.hbm [shape: f32[2,1,1,8,128], index: 6, kind: output, shape index: {4}]  }
   0x1   :  { %1709 = sst [smem:[#allocation23_spill]] %s1696_s0 }
   0x2   :  { %12 = vsyncpa [#allocation3], 0 }
   0x3   :  { %14 = vsyncpa [#allocation3 + $0x1], 0 }
   0x4   :  { %15 = vsyncpa [#allocation6], 0 }
   0x5   :  { %17 = vsyncpa [#allocation6 + $0x1], 0 }
   0x6   :  { %18 = vsyncpa [#allocation4], 0 }
   0x7   :  { %20 = vsyncpa [#allocation4 + $0x1], 0 }
   0x8   :  { %21 = vsyncpa [#allocation9], 0 }
   0x9   :  { %23 = vsyncpa [#allocation9 + $0x1], 0 }
   0xa   :  { %24 = vsyncpa [#allocation12], 0 }
   0xb   :  { %26 = vsyncpa [#allocation12 + $0x1], 0  ;;  %s1344_s21 = smov 0   ;;  %s1346_s22 = smov 0  }
   0xc   :  { %s1348_s23 = smov 0   ;;  %s1350_s24 = smov 0  }
   0xd   :  { %s1352_s25 = smov 0   ;;  %s1354_s26 = smov 0  }
   0xe LB: > { %1710 = sst [smem:[#allocation19_spill]] %s1283_s23  ;;  %s1375_s27 = sadd.s32 4294967295, %s1295_s26   ;;  %s1295_s26 = sphi %s1354_s26, %s32_s26   ;;  %s1291_s25 = sphi %s1352_s25, %s1731_s25   ;;  %s1287_s24 = sphi %s1350_s24, %s1730_s24   ;;  %s1283_s23 = sphi %s1348_s23, %s1726_s23   ;;  %s1279_s22 = sphi %s1346_s22, %s1729_s22   ;;  %s1275_s21 = sphi %s1344_s21, %s1728_s21  }
   0xf   : > { %s1703_s28 = sadd.s32 4294967294, %s1295_s26   ;;  %s51_s29 = sadd.s32 1, %s1291_s25 }
  0x10   : > { %s62_s30 = sadd.s32 1, %s1283_s23  ;;  %p53_p0 = scmp.ge.s32.totalorder %s51_s29, 2 }
  0x11   : > { %p69_p1 = scmp.ne.s32.totalorder %s1283_s23, %s1279_s22  ;;  %p70_p2 = scmp.eq.s32.totalorder %s1295_s26, 0 }
  0x12   : > { %p75_p3 = scmp.ne.s32.totalorder %s1279_s22, %s1275_s21  ;;  %s1733_s29 = smov (%p53_p0, %s51_s29), 0 }
  0x13   : > { %1711 = sst [smem:[#allocation20_spill]] %s1733_s29  ;;  %p1387_p4 = por %p70_p2, %p69_p1 }
  0x14   : > { %p76_p5 = scmp.eq.s32.totalorder %s1375_s27, 0  ;;  %s57_s8 = ssub.s32 %s1291_s25, %s1733_s29 }
  0x15   : > { %p131_p6 = scmp.eq.s32.totalorder %s1375_s27, 1  ;;  %p60_p7 = scmp.eq.s32.totalorder %s57_s8, 0 }
  0x16   : > { %p1395_p8 = por %p76_p5, %p75_p3  ;;  %p137_p10 = scmp.eq.s32.totalorder %s1703_s28, 1 }
  0x17   : > { %p1399_p9 = por %p131_p6, %p69_p1  ;;  %p880_p12 = scmp.ge.s32.totalorder %s1295_s26, 2 }
  0x18   : > { %s1406_s11 = scalar_select %p60_p7, %s1283_s23, %s62_s30  }
  0x19   : > { %p1408_p11 = por %p137_p10, %p75_p3  ;;  %p976_p13 = scmp.lt.s32.totalorder %s1295_s26, 2 }
  0x1a   : > { %1715 = sst [smem:[#allocation21_spill]] %s1406_s11  ;;  %s1415_s13 = sand.u32 1, %s1283_s23  }
  0x1b   : > { %s1716_s12 = scalar_select %p1408_p11, 1, 0 }
  0x1c   : > { %s881_s14 = sshll.u32 %s1415_s13, 5  ;;  %s935_s15 = sshll.u32 %s1291_s25, 9 }
  0x1d   : > { %1717 = sst [smem:[#allocation22_spill]] %s1716_s12  ;;  %s273_s19 = scalar_lea.vmem [#allocation2], %s881_s14 }
  0x1e   : > { %s1718_s0 = sld [smem:[#allocation23_spill]]  ;;  %s282_s20 = sshll.u32 %s273_s19, 4  ;;  %s283_s20 = int_to_ptr.vmem [resolvable:$true] %s282_s20 }
  0x1f   : > { %p1424_p0 = pnand %p976_p13, %p1387_p4  ;;  %p886_p1 = scmp.ge.s32.totalorder %s1295_s26, 1 }
  0x20   : > { %s270_s8 = scalar_lea.sflag [#allocation3], %s1415_s13  ;;  %s1056_s28 = scalar_lea.vmem %s283_s20, 512 }
  0x21   : > { %p1045_p2 = pneg %p1424_p0  ;;  %p1057_p3 = scmp.ne.s32.totalorder %s283_s20, %s1056_s28 }
  0x22   : > { %s1297_s14 = smov [#allocation2]  }
  0x23   : > { %p1059_p5 = pnand %p1057_p3, %p1045_p2 }
  0x24   : > { %s281_s18 = scalar_lea.hbm %s1718_s0, %s935_s15  ;;  %s1061_s15 = sshll.u32 %s1297_s14, 4  ;;  %s1062_s15 = int_to_ptr.vmem [resolvable:$false] %s1061_s15 }
  0x25   : > { %p1060_p6 = pneg %p1059_p5  ;;  %s1063_s7 = scalar_lea.vmem %s1062_s15, 1024 }
  0x26   : > { %p1064_p4 = scmp.lt.s32.totalorder %s283_s20, %s1062_s15  ;;  %p1065_p7 = scmp.lt.s32.totalorder %s1063_s7, %s1056_s28 }
  0x28   : > { %p1066_p10 = por %p1065_p7, %p1064_p4 }
  0x2a   : > { %p1067_p13 = pnand %p1066_p10, %p1060_p6 }
  0x2c   : > { %1070 = shalt.err (!%p1067_p13)
}
  0x2d   : > { %s1298_s16 = smov 128   ;;  %s1299_s17 = smov 8  }
  0x2e   : > { %956 = dma.hbm_to_vmem [thread:$0]  (!%p1424_p0), %s281_s18, 512, %s283_s20, %s270_s8, %s1298_s16, %s1298_s16, %s1299_s17  }
  0x2f   : > { %p310_p3 = scmp.lt.s32.totalorder %s1295_s26, 3  ;;  %s884_s19 = sshll.u32 %s1415_s13, 3 }
  0x30   : > { %s885_s14 = sshll.u32 %s1291_s25, 7  ;;  %s296_s29 = scalar_lea.vmem [#allocation5], %s884_s19 }
  0x31   : > { %p1442_p5 = pnand %p886_p1, %p310_p3  ;;  %s303_s0 = scalar_lea.hbm %s1697_s1, %s885_s14 }
  0x32   : > { %s305_s11 = sshll.u32 %s296_s29, 4  ;;  %s293_s23 = scalar_lea.sflag [#allocation6], %s1415_s13  ;;  %s306_s11 = int_to_ptr.vmem [resolvable:$true] %s305_s11 }
  0x33   : > { %s1084_s12 = scalar_lea.vmem %s306_s11, 128  ;;  %s1300_s18 = smov [#allocation5]  }
  0x34   : > { %p1085_p6 = scmp.ne.s32.totalorder %s306_s11, %s1084_s12  ;;  %s1089_s20 = sshll.u32 %s1300_s18, 4  ;;  %s1090_s20 = int_to_ptr.vmem [resolvable:$false] %s1089_s20 }
  0x35   : > { %s1091_s8 = scalar_lea.vmem %s1090_s20, 256  ;;  %p1092_p1 = scmp.lt.s32.totalorder %s306_s11, %s1090_s20 }
  0x36   : > { %p1087_p4 = pnand %p1085_p6, %p1045_p2  ;;  %p1093_p10 = scmp.lt.s32.totalorder %s1091_s8, %s1084_s12 }
  0x38   : > { %p1088_p7 = pneg %p1087_p4  ;;  %p1094_p13 = por %p1093_p10, %p1092_p1 }
  0x3a   : > { %p1095_p3 = pnand %p1094_p13, %p1088_p7 }
  0x3c   : > { %1098 = shalt.err (!%p1095_p3)
}
  0x3d   : > { %959 = dma.hbm_to_vmem [thread:$0]  (!%p1424_p0), %s303_s0, 128, %s306_s11, %s293_s23  }
  0x3e   : > { %314 = sbr.rel (%p1442_p5) target bundleno = 229 (0xe5), region = 28  ;;  %s1458_s29 = sand.u32 (!%p1442_p5), 1, %s1279_s22  }
  0x3f   : > { %s1461_s13 = sshll.u32 (!%p1442_p5), %s1458_s29, 5  ;;  %s317_s16 = scalar_lea.sflag (!%p1442_p5), [#allocation3], %s1458_s29 }
  0x40   : > { %s320_s12 = scalar_lea.vmem (!%p1442_p5), [#allocation2], %s1461_s13 }
  0x43   : > { %1254 = dma.done.wait (%p1395_p8), %s317_s16, 512  }
  0x44   : > { %1256 = vsyncadd (%p1395_p8), %s317_s16, 4294966784  ;;  %s1470_s0 = sshll.u32 %s1458_s29, 3  ;;  %s326_s23 = scalar_lea.sflag [#allocation6], %s1458_s29 }
  0x45   : > { %s329_s11 = scalar_lea.vmem [#allocation5], %s1470_s0 }
  0x46   : > { %1258 = dma.done.wait (%p1395_p8), %s326_s23, 128  }
  0x47   : > { %1260 = vsyncadd (%p1395_p8), %s326_s23, 4294967168  ;;  %v426_v0 = vld [vmem:[%s320_s12] sm:$0xff]  ;;  %v903_v1 = vld [vmem:[%s320_s12 + $0x8] sm:$0xff]  ;;  %v1301_v7 = vmov 0.0   ;;  %s1481_s9 = scalar_lea.vmem [#allocation10], %s1461_s13  ;;  %s1708_s30 = scalar_lea.vmem [#allocation13], %s1470_s0 }
  0x48   : > { %v904_v2 = vld [vmem:[%s320_s12 + $0x10] sm:$0xff]  ;;  %v436_v3 = vld [vmem:[%s329_s11] sm:$0xff]  ;;  %v437_v4 = vmax.f32 %v426_v0, %v903_v1  ;;  %v905_v5 = vld [vmem:[%s320_s12 + $0x18] sm:$0xff]  ;;  %s1707_s17 = sand.u32 1, %s1375_s27   ;;  %s936_s19 = sshll.u32 %s1287_s24, 9 }
  0x49   : > { %vm462_vm0 = vcmp.ne.s32.totalorder %v436_v3, 255  ;;  %vm465_vm1 = vcmp.eq.s32.totalorder %v436_v3, 0  ;;  %vm468_vm2 = vcmp.eq.s32.totalorder %v436_v3, 1  ;;  %vm471_vm3 = vcmp.eq.s32.totalorder %v436_v3, 2  ;;  %s361_s14 = scalar_lea.vmem [#allocation8], %s1461_s13  ;;  %s354_s15 = scalar_lea.vmem [#allocation7], %s1461_s13 }
  0x4a   : > { %v438_v6 = vmax.f32 %v437_v4, %v904_v2  ;;  %v1478_v8 = vsel %vm462_vm0, 1.0, %v1301_v7  ;;  %v907_v9 = vsel %vm465_vm1, 1.0, %v1301_v7  ;;  %v908_v10 = vsel %vm468_vm2, 1.0, %v1301_v7  ;;  %s583_s28 = sshll.u32 %s361_s14, 4  ;;  %s565_s7 = sshll.u32 %s354_s15, 4  ;;  %s1505_s28 = int_to_ptr.vmem [resolvable:$true] %s583_s28  ;;  %s1512_s7 = int_to_ptr.vmem [resolvable:$true] %s565_s7 }
  0x4b   : > { %v909_v11 = vsel %vm471_vm3, 1.0, %v1301_v7  ;;  %vm474_vm4 = vcmp.eq.s32.totalorder %v436_v3, 3  ;;  %517 = vst [vmem:[%s1481_s9] sm:$0xff] %v907_v9  ;;  %913 = vst [vmem:[%s1481_s9 + $0x8] sm:$0xff] %v908_v10  ;;  %s1502_s8 = scalar_lea.hbm %s1699_s3, %s936_s19  ;;  %s601_s16 = sshll.u32 %s1481_s9, 4  ;;  %s1519_s16 = int_to_ptr.vmem [resolvable:$true] %s601_s16 }
  0x4c   : > { %v439_v12 = vmax.f32 %v438_v6, %v905_v5  ;;  %v910_v13 = vsel %vm474_vm4, 1.0, %v1301_v7  ;;  %916 = vst [vmem:[%s1481_s9 + $0x10] sm:$0xff] %v909_v11  ;;  %528 = vst [vmem:[%s1708_s30] sm:$0xff] %v1478_v8  ;;  %s1510_s13 = scalar_lea.hbm %s1698_s2, %s936_s19  ;;  %s1517_s18 = scalar_lea.hbm %s1700_s4, %s936_s19 }
  0x4d   : > { %919 = vst [vmem:[%s1481_s9 + $0x18] sm:$0xff] %v910_v13  ;;  %s1099_s20 = scalar_lea.vmem %s1505_s28, 512  ;;  %s1302_s19 = smov [#allocation8]  }
  0x4e   : > { %v440_v14 = vsub.f32 %v426_v0, %v439_v12  ;;  %v443_v15 = vsub.f32 %v903_v1, %v439_v12  ;;  %v446_v16 = vsub.f32 %v904_v2, %v439_v12  ;;  %v449_v17 = vsub.f32 %v905_v5, %v439_v12  ;;  %p1100_p8 = scmp.ne.s32.totalorder %s1505_s28, %s1099_s20  ;;  %s1103_s12 = sshll.u32 %s1302_s19, 4  ;;  %s1104_s12 = int_to_ptr.vmem [resolvable:$false] %s1103_s12 }
  0x4f   : > { %s1105_s23 = scalar_lea.vmem %s1104_s12, 1024  ;;  %p1106_p5 = scmp.lt.s32.totalorder %s1505_s28, %s1104_s12 }
  0x50   : > { %v441_v18 = vmul.f32 1.442695, %v440_v14  ;;  %v444_v19 = vmul.f32 1.442695, %v443_v15  ;;  %v447_v20 = vmul.f32 1.442695, %v446_v16  ;;  %v477_v29 = vmul.f32 %v907_v9, %v440_v14  ;;  %p1101_p0 = pnand %p1100_p8, %p1399_p9  ;;  %p1107_p6 = scmp.lt.s32.totalorder %s1105_s23, %s1099_s20 }
  0x51   : > { %v450_v21 = vmul.f32 1.442695, %v449_v17  ;;  %v479_v30 = vmul.f32 %v908_v10, %v443_v15  ;;  %v483_v32 = vmul.f32 %v909_v11, %v446_v16  ;;  %v487_v38 = vmul.f32 %v910_v13, %v449_v17 }
  0x52   : > { %1031 = vpow2.f32 %v441_v18  ;;  %p1102_p2 = pneg %p1101_p0  ;;  %p1108_p4 = por %p1107_p6, %p1106_p5 }
  0x53   : > { %1033 = vpow2.f32 %v444_v19  ;;  %v480_v33 = vadd.f32 %v479_v30, %v477_v29 }
  0x54   : > { %1035 = vpow2.f32 %v447_v20  ;;  %p1109_p7 = pnand %p1108_p4, %p1102_p2 }
  0x55   : > { %1037 = vpow2.f32 %v450_v21  ;;  %v484_v46 = vadd.f32 %v483_v32, %v480_v33 }
  0x57   : > { %v1523_v52 = vadd.f32 %v487_v38, %v484_v46 }
  0x5f   : > { %v1032_v22 = vpop.eup %1031 }
  0x60   : > { %v1034_v23 = vpop.eup %1033 }
  0x61   : > { %v1036_v24 = vpop.eup %1035  ;;  %v452_v25 = vadd.f32 %v1034_v23, %v1032_v22 }
  0x62   : > { %v1038_v26 = vpop.eup %1037 }
  0x63   : > { %v453_v27 = vadd.f32 %v1036_v24, %v452_v25 }
  0x65   : > { %v454_v28 = vadd.f32 %v1038_v26, %v453_v27 }
  0x67   : > { %1039 = vrcp.f32 %v454_v28 }
  0x68   : > { %1041 = vlog2.f32 %v454_v28 }
  0x74   : > { %v1040_v31 = vpop.eup %1039 }
  0x75   : > { %v456_v34 = vmul.f32 %v1040_v31, %v1032_v22  ;;  %v457_v35 = vmul.f32 %v1040_v31, %v1034_v23  ;;  %v458_v36 = vmul.f32 %v1040_v31, %v1036_v24  ;;  %v459_v37 = vmul.f32 %v1040_v31, %v1038_v26  ;;  %v1042_v49 = vpop.eup %1041 }
  0x76   : > { %v1521_v51 = vmul.f32 0.6931472, %v1042_v49 }
  0x77   : > { %v478_v39 = vmul.f32 %v907_v9, %v456_v34  ;;  %v501_v40 = vmul.f32 %v1478_v8, %v456_v34  ;;  %v481_v41 = vmul.f32 %v908_v10, %v457_v35  ;;  %v503_v42 = vmul.f32 %v1478_v8, %v457_v35 }
  0x78   : > { %v485_v43 = vmul.f32 %v909_v11, %v458_v36  ;;  %v505_v44 = vmul.f32 %v1478_v8, %v458_v36  ;;  %v507_v45 = vmul.f32 %v1478_v8, %v459_v37  ;;  %v489_v48 = vmul.f32 %v910_v13, %v459_v37 }
  0x79   : > { %v482_v47 = vadd.f32 %v481_v41, %v478_v39  ;;  %516 = vst [vmem:[%s361_s14] sm:$0xff] %v501_v40  ;;  %912 = vst [vmem:[%s361_s14 + $0x8] sm:$0xff] %v503_v42 }
  0x7a   : > { %915 = vst [vmem:[%s361_s14 + $0x10] sm:$0xff] %v505_v44  ;;  %918 = vst [vmem:[%s361_s14 + $0x18] sm:$0xff] %v507_v45  ;;  %s1529_s14 = scalar_lea.sflag [#allocation9], %s1707_s17 }
  0x7b   : > { %v486_v50 = vadd.f32 %v485_v43, %v482_v47  ;;  %515 = vst [vmem:[%s354_s15] sm:$0xff] %v478_v39  ;;  %911 = vst [vmem:[%s354_s15 + $0x8] sm:$0xff] %v481_v41 }
  0x7c   : > { %914 = vst [vmem:[%s354_s15 + $0x10] sm:$0xff] %v485_v43  ;;  %917 = vst [vmem:[%s354_s15 + $0x18] sm:$0xff] %v489_v48 }
  0x7d   : > { %v1525_v53 = vadd.f32 %v489_v48, %v486_v50 }
  0x7e   : > { %1112 = shalt.err (!%p1109_p7)
}
  0x7f   : > { %s1113_s15 = scalar_lea.hbm %s1502_s8, 512  ;;  %s1117_s19 = scalar_lea.hbm %s1699_s3, 1024 }
  0x80   : > { %p1114_p1 = scmp.ne.s32.totalorder %s1502_s8, %s1113_s15  ;;  %p1118_p3 = scmp.lt.s32.totalorder %s1502_s8, %s1699_s3 }
  0x81   : > { %p1119_p8 = scmp.lt.s32.totalorder %s1117_s19, %s1113_s15 }
  0x82   : > { %p1115_p10 = pnand %p1114_p1, %p1399_p9 }
  0x83   : > { %p1120_p0 = por %p1119_p8, %p1118_p3 }
  0x84   : > { %p1116_p13 = pneg %p1115_p10 }
  0x86   : > { %p1121_p2 = pnand %p1120_p0, %p1116_p13 }
  0x88   : > { %1124 = shalt.err (!%p1121_p2)
}
  0x89   : > { %s1303_s20 = smov 128   ;;  %s1304_s12 = smov 8  }
  0x8a   : > { %944 = dma.vmem_to_hbm [thread:$0]  (%p1399_p9), %s1505_s28, 512, %s1502_s8, %s1529_s14, %s1303_s20, %s1303_s20, %s1304_s12  }
  0x8b   : > { %s530_s30 = scalar_lea.sflag [#allocation4], %s1458_s29  ;;  %s1125_s17 = scalar_lea.vmem %s1512_s7, 512 }
  0x8c   : > { %p1126_p5 = scmp.ne.s32.totalorder %s1512_s7, %s1125_s17  ;;  %s1305_s23 = smov [#allocation7]  }
  0x8d   : > { %s1129_s15 = sshll.u32 %s1305_s23, 4  ;;  %s1130_s15 = int_to_ptr.vmem [resolvable:$false] %s1129_s15 }
  0x8e   : > { %p1127_p6 = pnand %p1126_p5, %p1399_p9  ;;  %s1131_s11 = scalar_lea.vmem %s1130_s15, 1024 }
  0x8f   : > { %p1132_p7 = scmp.lt.s32.totalorder %s1512_s7, %s1130_s15  ;;  %p1133_p1 = scmp.lt.s32.totalorder %s1131_s11, %s1125_s17 }
  0x90   : > { %p1128_p4 = pneg %p1127_p6 }
  0x91   : > { %p1134_p10 = por %p1133_p1, %p1132_p7 }
  0x93   : > { %p1135_p13 = pnand %p1134_p10, %p1128_p4 }
  0x95   : > { %1138 = shalt.err (!%p1135_p13)
}
  0x96   : > { %s1139_s28 = scalar_lea.hbm %s1510_s13, 512  ;;  %s1143_s9 = scalar_lea.hbm %s1698_s2, 1024 }
  0x97   : > { %p1140_p3 = scmp.ne.s32.totalorder %s1510_s13, %s1139_s28  ;;  %p1144_p2 = scmp.lt.s32.totalorder %s1510_s13, %s1698_s2 }
  0x98   : > { %p1145_p5 = scmp.lt.s32.totalorder %s1143_s9, %s1139_s28 }
  0x99   : > { %p1141_p8 = pnand %p1140_p3, %p1399_p9 }
  0x9a   : > { %p1146_p6 = por %p1145_p5, %p1144_p2 }
  0x9b   : > { %p1142_p0 = pneg %p1141_p8 }
  0x9d   : > { %p1147_p4 = pnand %p1146_p6, %p1142_p0 }
  0x9f   : > { %1150 = shalt.err (!%p1147_p4)
}
  0xa0   : > { %943 = dma.vmem_to_hbm [thread:$0]  (%p1399_p9), %s1512_s7, 512, %s1510_s13, %s530_s30, %s1303_s20, %s1303_s20, %s1304_s12   ;;  %v492_v54 = vsub.f32 1.0, %v1525_v53 }
  0xa1   : > { %s1151_s17 = scalar_lea.vmem %s1519_s16, 512  ;;  %s1306_s15 = smov [#allocation10]  }
  0xa2   : > { %p1152_p7 = scmp.ne.s32.totalorder %s1519_s16, %s1151_s17  ;;  %s1155_s11 = sshll.u32 %s1306_s15, 4  ;;  %s1156_s11 = int_to_ptr.vmem [resolvable:$false] %s1155_s11 }
  0xa3   : > { %s1157_s28 = scalar_lea.vmem %s1156_s11, 1024  ;;  %p1158_p13 = scmp.lt.s32.totalorder %s1519_s16, %s1156_s11 }
  0xa4   : > { %p1153_p1 = pnand %p1152_p7, %p1399_p9  ;;  %p1159_p3 = scmp.lt.s32.totalorder %s1157_s28, %s1151_s17 }
  0xa6   : > { %p1154_p10 = pneg %p1153_p1  ;;  %p1160_p8 = por %p1159_p3, %p1158_p13 }
  0xa8   : > { %p1161_p0 = pnand %p1160_p8, %p1154_p10 }
  0xaa   : > { %1164 = shalt.err (!%p1161_p0)
}
  0xab   : > { %s1165_s7 = scalar_lea.hbm %s1517_s18, 512  ;;  %s1169_s29 = scalar_lea.hbm %s1700_s4, 1024 }
  0xac   : > { %p1166_p2 = scmp.ne.s32.totalorder %s1517_s18, %s1165_s7  ;;  %p1170_p4 = scmp.lt.s32.totalorder %s1517_s18, %s1700_s4 }
  0xad   : > { %p1171_p7 = scmp.lt.s32.totalorder %s1169_s29, %s1165_s7 }
  0xae   : > { %p1167_p5 = pnand %p1166_p2, %p1399_p9 }
  0xaf   : > { %p1172_p1 = por %p1171_p7, %p1170_p4 }
  0xb0   : > { %p1168_p6 = pneg %p1167_p5 }
  0xb2   : > { %p1173_p10 = pnand %p1172_p1, %p1168_p6 }
  0xb4   : > { %1176 = shalt.err (!%p1173_p10)
}
  0xb5   : > { %945 = dma.vmem_to_hbm [thread:$0]  (%p1399_p9), %s1519_s16, 512, %s1517_s18, %s1529_s14, %s1303_s20, %s1303_s20, %s1304_s12   ;;  %v491_v55 = vsub.f32 %v1523_v52, %v1521_v51  ;;  %v493_v56 = vmax.f32 %v492_v54, 0.0 }
  0xb6   : > { %s931_s19 = sshll.u32 %s1287_s24, 7  ;;  %s375_s23 = scalar_lea.vmem [#allocation11], %s1470_s0 }
  0xb7   : > { %v494_v57 = vmul.f32 %v493_v56, %v493_v56  ;;  %s618_s17 = sshll.u32 %s375_s23, 4  ;;  %s1721_s15 = scalar_lea.vmem [#allocation13], %s1470_s0  ;;  %s1616_s17 = int_to_ptr.vmem [resolvable:$true] %s618_s17 }
  0xb8   : > { %s632_s11 = sshll.u32 %s1721_s15, 4  ;;  %s1614_s13 = scalar_lea.hbm %s1701_s5, %s931_s19  ;;  %s1618_s11 = int_to_ptr.vmem [resolvable:$true] %s632_s11 }
  0xb9   : > { %v495_v58 = vmul.f32 %v494_v57, %v491_v55  ;;  %s1623_s18 = scalar_lea.hbm %s1702_s6, %s931_s19  ;;  %s1722_s0 = sand.u32 1, %s1375_s27  }
  0xba   : > { %s1627_s14 = scalar_lea.sflag [#allocation12], %s1722_s0  ;;  %s1177_s20 = scalar_lea.vmem %s1616_s17, 128 }
  0xbb   : > { %v496_v59 = vmul.f32 %v1478_v8, %v495_v58  ;;  %p1178_p13 = scmp.ne.s32.totalorder %s1616_s17, %s1177_s20  ;;  %s1307_s12 = smov [#allocation11]  }
  0xbc   : > { %s1181_s30 = sshll.u32 %s1307_s12, 4  ;;  %s1182_s30 = int_to_ptr.vmem [resolvable:$false] %s1181_s30 }
  0xbd   : > { %527 = vst [vmem:[%s375_s23] sm:$0xff] %v496_v59  ;;  %p1179_p3 = pnand %p1178_p13, %p1399_p9  ;;  %s1183_s29 = scalar_lea.vmem %s1182_s30, 256 }
  0xbe   : > { %p1184_p0 = scmp.lt.s32.totalorder %s1616_s17, %s1182_s30  ;;  %p1185_p2 = scmp.lt.s32.totalorder %s1183_s29, %s1177_s20 }
  0xbf   : > { %p1180_p8 = pneg %p1179_p3 }
  0xc0   : > { %p1186_p5 = por %p1185_p2, %p1184_p0 }
  0xc2   : > { %p1187_p6 = pnand %p1186_p5, %p1180_p8 }
  0xc4   : > { %1190 = shalt.err (!%p1187_p6)
}
  0xc5   : > { %s1191_s27 = scalar_lea.hbm %s1614_s13, 128  ;;  %s1195_s19 = scalar_lea.hbm %s1701_s5, 256 }
  0xc6   : > { %p1192_p4 = scmp.ne.s32.totalorder %s1614_s13, %s1191_s27  ;;  %p1196_p10 = scmp.lt.s32.totalorder %s1614_s13, %s1701_s5 }
  0xc7   : > { %p1197_p13 = scmp.lt.s32.totalorder %s1195_s19, %s1191_s27 }
  0xc8   : > { %p1193_p7 = pnand %p1192_p4, %p1399_p9 }
  0xc9   : > { %p1198_p3 = por %p1197_p13, %p1196_p10 }
  0xca   : > { %p1194_p1 = pneg %p1193_p7 }
  0xcc   : > { %p1199_p8 = pnand %p1198_p3, %p1194_p1 }
  0xce   : > { %1202 = shalt.err (!%p1199_p8)
}
  0xcf   : > { %946 = dma.vmem_to_hbm [thread:$0]  (%p1399_p9), %s1616_s17, 128, %s1614_s13, %s1627_s14  }
  0xd0   : > { %s1203_s28 = scalar_lea.vmem %s1618_s11, 128  ;;  %s1308_s7 = smov [#allocation13]  }
  0xd1   : > { %p1204_p0 = scmp.ne.s32.totalorder %s1618_s11, %s1203_s28  ;;  %s1207_s16 = sshll.u32 %s1308_s7, 4  ;;  %s1208_s16 = int_to_ptr.vmem [resolvable:$false] %s1207_s16 }
  0xd2   : > { %s1209_s24 = scalar_lea.vmem %s1208_s16, 256  ;;  %p1210_p6 = scmp.lt.s32.totalorder %s1618_s11, %s1208_s16 }
  0xd3   : > { %p1205_p2 = pnand %p1204_p0, %p1399_p9  ;;  %p1211_p4 = scmp.lt.s32.totalorder %s1209_s24, %s1203_s28 }
  0xd5   : > { %p1206_p5 = pneg %p1205_p2  ;;  %p1212_p7 = por %p1211_p4, %p1210_p6 }
  0xd7   : > { %p1213_p1 = pnand %p1212_p7, %p1206_p5 }
  0xd9   : > { %1216 = shalt.err (!%p1213_p1)
}
  0xda   : > { %s1217_s0 = scalar_lea.hbm %s1623_s18, 128  ;;  %s1221_s20 = scalar_lea.hbm %s1702_s6, 256 }
  0xdb   : > { %p1218_p10 = scmp.ne.s32.totalorder %s1623_s18, %s1217_s0  ;;  %p1222_p8 = scmp.lt.s32.totalorder %s1623_s18, %s1702_s6 }
  0xdc   : > { %p1223_p0 = scmp.lt.s32.totalorder %s1221_s20, %s1217_s0 }
  0xdd   : > { %p1219_p13 = pnand %p1218_p10, %p1399_p9 }
  0xde   : > { %p1224_p2 = por %p1223_p0, %p1222_p8 }
  0xdf   : > { %p1220_p3 = pneg %p1219_p13 }
  0xe1   : > { %p1225_p5 = pnand %p1224_p2, %p1220_p3 }
  0xe3   : > { %1228 = shalt.err (!%p1225_p5)
}
  0xe4   : > { %947 = dma.vmem_to_hbm [thread:$0]  (%p1399_p9), %s1618_s11, 128, %s1623_s18, %s1627_s14  }
  0xe5 PF: > { %s644_s27 = sand.u32 1, %s1275_s21   ;;  %p961_p6 = pnand %p880_p12, %p1408_p11 }
  0xe6   : > { %s645_s8 = scalar_lea.sflag [#allocation4], %s644_s27 }
  0xe7   : > { %p962_p4 = pneg %p961_p6 }
  0xe9   : > { %1262 = dma.done.wait (%p962_p4), %s645_s8, 512  }
  0xea   : > { %1264 = vsyncadd (%p962_p4), %s645_s8, 4294966784  ;;  %s1724_s9 = sadd.s32 4294967294, %s1295_s26  }
  0xeb   : > { %s653_s19 = sand.u32 1, %s1724_s9  }
  0xec   : > { %s654_s10 = scalar_lea.sflag [#allocation9], %s653_s19 }
  0xed   : > { %1266 = dma.done.wait (%p962_p4), %s654_s10, 1024  }
  0xee   : > { %1268 = vsyncadd (%p962_p4), %s654_s10, 4294966272  ;;  %s672_s23 = scalar_lea.sflag [#allocation12], %s653_s19 }
  0xef   : > { %1270 = dma.done.wait (%p962_p4), %s672_s23, 256  }
  0xf0   : > { %1272 = vsyncadd (%p962_p4), %s672_s23, 4294967040  ;;  %s32_s26 = sadd.s32 1, %s1295_s26   ;;  %s1725_s11 = sld [smem:[#allocation19_spill]] }
  0xf1   : > { %p29_p9 = scmp.ge.s32.totalorder %s32_s26, 4   ;;  %s1726_s23 = sld [smem:[#allocation21_spill]] }
  0xf2   : > { %s1727_s18 = sld [smem:[#allocation20_spill]]  ;;  %s1728_s21 = smov %s1279_s22 }
  0xf3   : > { %s1730_s24 = smov %s1291_s25 }
  0xf4   :  { %31 = sbr.rel (!%p29_p9) target bundleno = 14 (0xe), region = 166 }
  0xf6   : > { %s1729_s22 = smov %s1725_s11 }
  0xf8   : > { %s1731_s25 = smov %s1727_s18 }
  0xf9   :  { %686 = vsyncpa [#allocation3], 1 }
  0xfa   :  { %688 = vsyncpa [#allocation3 + $0x1], 1 }
  0xfb   :  { %689 = vsyncpa [#allocation6], 1 }
  0xfc   :  { %691 = vsyncpa [#allocation6 + $0x1], 1 }
  0xfd   :  { %692 = vsyncpa [#allocation4], 1 }
  0xfe   :  { %694 = vsyncpa [#allocation4 + $0x1], 1 }
  0xff   :  { %695 = vsyncpa [#allocation9], 1 }
 0x100   :  { %697 = vsyncpa [#allocation9 + $0x1], 1 }
 0x101   :  { %698 = vsyncpa [#allocation12], 1 }
 0x102   :  { %700 = vsyncpa [#allocation12 + $0x1], 1 }

</bundles_post_ra>
